<compile_context>
chip_gen: v6e
topology: v6e:2x2x1
jax: 0.10.0
libtpu: 0.0.40
codegen_flags: <defaults>
</compile_context>

<pallas_src>
import functools
import math

import jax
import jax.numpy as jnp
from jax.experimental import pallas as pl
from jax.experimental.pallas import tpu as pltpu


def _round_up(x, m):
    return (x + m - 1) // m * m


def _vmem_capacity_bytes():
    try:
        return int(pltpu.get_tpu_info().vmem_capacity_bytes)
    except Exception:
        return 64 * 1024 * 1024  # conservative fallback (v7x per-core VMEM)


# ----------------------------- Pallas kernel -------------------------------
def _stft_loss_kernel(xf_ref, yf_ref, basis_ref, out_ref, *, ck, num_chunks):
    """Per-tile STFT-loss partial sums.

    xf_ref, yf_ref : (M_TILE, fft)      bf16 un-windowed frames (pred / target)
    basis_ref      : (fft, 2*half_pad)  bf16 window-folded DFT basis, laid out
                                        as chunk-interleaved [cos_c | sin_c]
                                        blocks of ck lanes.  sin lane 0 of
                                        chunk 0 holds the Nyquist cos column.
    out_ref        : (8, 128)           f32 lane-dense per-tile partials:
                       sublane 0 -> sum((y_mag - x_mag)^2)
                       sublane 1 -> sum(y_mag^2)          (unclamped power)
                       sublane 2 -> sum(|log y_mag - log x_mag|)
    """
    xf = xf_ref[...]
    yf = yf_ref[...]

    diff_s = jnp.float32(0.0)
    ysq_s = jnp.float32(0.0)
    l1_s = jnp.float32(0.0)

    for c in range(num_chunks):          # static K-chunk loop over the basis
        bchunk = basis_ref[:, 2 * c * ck:2 * (c + 1) * ck]
        xw = jnp.dot(xf, bchunk, preferred_element_type=jnp.float32)
        yw = jnp.dot(yf, bchunk, preferred_element_type=jnp.float32)

        # ||y_mag||_F^2 is linear in per-bin power: the plain sum of squares of
        # all columns (real, imag, packed Nyquist) is exactly the sum over the
        # valid bins; zero basis padding / zero frame padding contribute 0.
        ysq_s = ysq_s + jnp.sum(yw * yw)

        xr, xi = xw[:, :ck], xw[:, ck:]
        yr, yi = yw[:, :ck], yw[:, ck:]

        if c == 0:
            # sin lane 0 of chunk 0 is the packed Nyquist *real* part: drop it
            # from the per-lane power and handle the Nyquist bin on a narrow
            # column so DC (cos lane 0) and Nyquist stay separate bins.
            lane = jax.lax.broadcasted_iota(jnp.int32, xi.shape, 1)
            keep = lane != 0
            xim = jnp.where(keep, xi, 0.0)
            yim = jnp.where(keep, yi, 0.0)
            xpow = jnp.maximum(xr * xr + xim * xim, 1e-7)
            ypow = jnp.maximum(yr * yr + yim * yim, 1e-7)

            xn = xi[:, 0:1]
            yn = yi[:, 0:1]
            xpn = jnp.maximum(xn * xn, 1e-7)
            ypn = jnp.maximum(yn * yn, 1e-7)
            diff_s = diff_s + jnp.sum(xpn + ypn - 2.0 * jnp.sqrt(xpn * ypn))
            l1_s = l1_s + 0.5 * jnp.sum(jnp.abs(jnp.log(ypn) - jnp.log(xpn)))
        else:
            xpow = jnp.maximum(xr * xr + xi * xi, 1e-7)
            ypow = jnp.maximum(yr * yr + yi * yi, 1e-7)

        # (|y| - |x|)^2 = xpow + ypow - 2*sqrt(xpow*ypow): one sqrt per bin.
        # Padded rows / padded lanes (both clamp to 1e-7) contribute exactly 0.
        diff_s = diff_s + jnp.sum(xpow + ypow - 2.0 * jnp.sqrt(xpow * ypow))
        # |log|y| - log|x|| = 0.5 * |log ypow - log xpow|  (half the EUP logs).
        l1_s = l1_s + 0.5 * jnp.sum(jnp.abs(jnp.log(ypow) - jnp.log(xpow)))

    # Lane-dense (8, 128) unmasked store of the three scalars.
    sub = jax.lax.broadcasted_iota(jnp.int32, (8, 128), 0)
    out_ref[...] = jnp.where(
        sub == 0, diff_s,
        jnp.where(sub == 1, ysq_s, jnp.where(sub == 2, l1_s, 0.0)))


def _stft_loss_sums(x_frames, y_frames, basis, *, m_tile, ck, vmem_limit):
    """Launch the tiled kernel; returns (sum diff^2, sum y_mag^2, sum L1)."""
    m_pad, fft = x_frames.shape
    two_half_pad = basis.shape[1]
    half_pad = two_half_pad // 2
    num_tiles = m_pad // m_tile
    num_chunks = half_pad // ck

    kernel = functools.partial(_stft_loss_kernel, ck=ck, num_chunks=num_chunks)

    flops = 2 * 2 * m_pad * fft * two_half_pad        # two matmuls per chunk
    transcendentals = 3 * m_pad * half_pad            # 1 sqrt + 2 log per bin
    bytes_accessed = (2 * m_pad * fft * 2             # bf16 frame tiles (x, y)
                      + fft * two_half_pad * 2        # resident bf16 basis
                      + num_tiles * 8 * 128 * 4)      # f32 partial outputs

    partials = pl.pallas_call(
        kernel,
        out_shape=jax.ShapeDtypeStruct((num_tiles * 8, 128), jnp.float32),
        grid_spec=pltpu.PrefetchScalarGridSpec(
            num_scalar_prefetch=0,
            grid=(num_tiles,),
            in_specs=[
                pl.BlockSpec((m_tile, fft), lambda i: (i, 0)),
                pl.BlockSpec((m_tile, fft), lambda i: (i, 0)),
                # Constant index map -> fetched once, stays resident in VMEM.
                # TODO(synk): single-buffer this resident block
                # (pipeline_mode=pl.Buffered(1)) to reclaim the unused second
                # basis buffer on v7x once buffer_count=1 is verified.
                pl.BlockSpec((fft, two_half_pad), lambda i: (0, 0)),
            ],
            out_specs=pl.BlockSpec((8, 128), lambda i: (i, 0)),
        ),
        compiler_params=pltpu.CompilerParams(
            dimension_semantics=("parallel",),        # tiles are independent
            vmem_limit_bytes=vmem_limit,
        ),
        cost_estimate=pl.CostEstimate(
            flops=flops, transcendentals=transcendentals,
            bytes_accessed=bytes_accessed),
    )(x_frames, y_frames, basis)

    p = partials.reshape(num_tiles, 8, 128)
    return jnp.sum(p[:, 0, 0]), jnp.sum(p[:, 1, 0]), jnp.sum(p[:, 2, 0])


# ------------------------------- JAX glue -----------------------------------
def _hann_window(win_length):
    # matches torch.hann_window(win_length) (periodic=True)
    n = jnp.arange(win_length, dtype=jnp.float32)
    return 0.5 - 0.5 * jnp.cos(2.0 * math.pi * n / win_length)


def _frame_signal(x, fft_size, hop_size):
    """torch.stft framing (center=True, reflect pad) without a gather:
    the padded signal is reshaped into hop-sized rows and the frames are
    assembled from ceil(fft/hop) shifted slices + one concat (no dynamic
    gather to mis-lower).  Frames are UN-windowed bf16; the Hann window is
    folded into the DFT basis."""
    B, T = x.shape
    pad = fft_size // 2
    xp = jnp.pad(x, ((0, 0), (pad, pad)), mode="reflect")       # (B, T + fft)
    n_frames = 1 + T // hop_size
    q = -(-fft_size // hop_size)                                # ceil(fft/hop)
    need = (n_frames + q - 1) * hop_size
    if need > xp.shape[1]:
        xp = jnp.pad(xp, ((0, 0), (0, need - xp.shape[1])))     # unused tail
    elif need < xp.shape[1]:
        xp = xp[:, :need]
    hopped = xp.reshape(B, n_frames + q - 1, hop_size)          # row m = xp[m*hop:(m+1)*hop]
    slabs = [hopped[:, c:c + n_frames, :] for c in range(q)]    # q cheap slices
    frames = jnp.concatenate(slabs, axis=-1)[:, :, :fft_size]   # (B, F, fft)
    # TODO(synk): build frame tiles in-kernel (per-row DMA from the padded
    # signal with memory_space=pl.ANY) to remove the remaining ~fft/hop HBM
    # read amplification of the materialized bf16 frame matrix.
    return frames.astype(jnp.bfloat16).reshape(B * n_frames, fft_size)


def _windowed_dft_basis(fft_size, win_length, half_pad, ck):
    """bf16 window-folded DFT basis of width 2*half_pad, chunk-interleaved as
    [cos_c | sin_c] blocks of ck lanes each.

    cos lanes cover bins 0..fft/2-1.  The sin column of bin 0 is identically
    zero, so it is re-used for the Nyquist-bin cosine column: for fft >= 256
    every lane does useful MXU work (no per-half 128-lane padding)."""
    half = fft_size // 2
    win = _hann_window(win_length)
    lpad = (fft_size - win_length) // 2
    win_full = jnp.pad(win, (lpad, fft_size - win_length - lpad))   # (fft,)
    n = jnp.arange(fft_size, dtype=jnp.float32)[:, None]
    k = jnp.arange(half, dtype=jnp.float32)[None, :]
    ang = 2.0 * math.pi * n * k / fft_size
    cos_b = jnp.cos(ang) * win_full[:, None]                        # (fft, half)
    sin_b = jnp.sin(ang) * win_full[:, None]                        # (fft, half)
    # Nyquist bin (k = fft/2): real basis = win * (-1)^n, imag part = 0.
    sign = jnp.where(jnp.arange(fft_size) % 2 == 0, 1.0, -1.0)
    sin_b = sin_b.at[:, 0].set(win_full * sign)
    if half_pad > half:                                             # small fft only
        zp = ((0, 0), (0, half_pad - half))
        cos_b = jnp.pad(cos_b, zp)
        sin_b = jnp.pad(sin_b, zp)
    chunks = []
    for c in range(half_pad // ck):
        chunks.append(cos_b[:, c * ck:(c + 1) * ck])
        chunks.append(sin_b[:, c * ck:(c + 1) * ck])
    return jnp.concatenate(chunks, axis=1).astype(jnp.bfloat16)     # (fft, 2*half_pad)


def stft_loss(x, y, fft_size, hop_size, win_length):
    """Single-resolution STFT loss (sc_loss, mag_loss), each scaled by
    fft_size / 2048 as in the reference STFTLoss module."""
    half = fft_size // 2
    half_pad = _round_up(half, 128)
    ck = 256 if half_pad % 256 == 0 else 128
    K = half + 1                                         # onesided bin count

    xf = _frame_signal(x, fft_size, hop_size)
    yf = _frame_signal(y, fft_size, hop_size)
    m = xf.shape[0]                                      # B * n_frames

    # Generation-gated tile size / VMEM limit: v5e/v6e have 128 MiB VMEM,
    # v7x has 64 MiB per TensorCore.
    if _vmem_capacity_bytes() >= 96 * 1024 * 1024:
        cap = 512 if fft_size >= 2048 else 1024
        vmem_limit = 96 * 1024 * 1024
    else:
        cap = 256 if fft_size >= 2048 else 512
        vmem_limit = 48 * 1024 * 1024

    m_tile = min(cap, _round_up(m, 16))                  # bf16 sublane packing
    # Keep at least two grid tiles when there is enough work so both v7x
    # TensorCores (and the software pipeline) have something to do.
    if m_tile > 256 and _round_up(m, m_tile) // m_tile < 2:
        m_tile = _round_up((m + 1) // 2, 16)
    m_pad = _round_up(m, m_tile)
    if m_pad > m:
        xf = jnp.pad(xf, ((0, m_pad - m), (0, 0)))
        yf = jnp.pad(yf, ((0, m_pad - m), (0, 0)))

    basis = _windowed_dft_basis(fft_size, win_length, half_pad, ck)

    diff, ysq, l1 = _stft_loss_sums(xf, yf, basis, m_tile=m_tile, ck=ck,
                                    vmem_limit=vmem_limit)
    factor = fft_size / 2048.0
    sc = jnp.sqrt(diff) / jnp.sqrt(ysq) * factor         # Frobenius ratio
    mag = (l1 / (m * K)) * factor                        # mean L1 of log mags
    return sc, mag


def loss_func(outputs, label, cfg):
    """LossFunc.forward: outputs/label are (B, 1, T); returns sc + mag loss."""
    x = outputs[:, 0, :]
    y = label[:, 0, :]

    if cfg["loss_mode"] == "STFT":
        sc, mag = stft_loss(x, y, 1024, 120, 600)
        return sc + mag

    # MRSTFT
    fft_sizes = cfg["fft_sizes"] if cfg["fft_sizes"] is not None else [1024, 2048, 512]
    hop_sizes = cfg["hop_sizes"] if cfg["hop_sizes"] is not None else [120, 240, 50]
    win_lengths = cfg["win_lengths"] if cfg["win_lengths"] is not None else [600, 1200, 240]
    assert len(fft_sizes) == len(hop_sizes) == len(win_lengths)

    sc_loss = 0.0
    mag_loss = 0.0
    for fs, ss, wl in zip(fft_sizes, hop_sizes, win_lengths):
        sc, mag = stft_loss(x, y, fs, ss, wl)
        sc_loss = sc_loss + sc
        mag_loss = mag_loss + mag
    n = len(fft_sizes)
    sc_loss = sc_loss / n
    mag_loss = mag_loss / n
    return cfg["factor_sc"] * sc_loss + cfg["factor_mag"] * mag_loss


# --------------------------------- main --------------------------------------
if __name__ == "__main__":
    # Small, deterministic example. Only 'hann_window' is supported here.
    cfg = {
        "loss_mode": "MRSTFT",
        "fft_sizes": [128, 256, 64],
        "hop_sizes": [32, 64, 16],
        "win_lengths": [80, 160, 40],
        "window": "hann_window",
        "factor_sc": 0.1,
        "factor_mag": 0.1,
    }

    key = jax.random.PRNGKey(0)
    k1, k2 = jax.random.split(key)
    B, T = 2, 256
    outputs = jax.random.normal(k1, (B, 1, T), dtype=jnp.float32)
    label = jax.random.normal(k2, (B, 1, T), dtype=jnp.float32)

    loss = loss_func(outputs, label, cfg)
    loss = jax.block_until_ready(loss)
    assert jnp.isfinite(loss), "loss is not finite"
    print("KERNEL_OK")
</pallas_src>

<mosaic_0001>
module attributes {stable_mosaic.version = 11 : i64} {
  func.func @_stft_loss_kernel(%arg0: i32, %arg1: memref<32x128xbf16, #tpu.memory_space<vmem>>, %arg2: memref<32x128xbf16, #tpu.memory_space<vmem>>, %arg3: memref<128x256xbf16, #tpu.memory_space<vmem>>, %arg4: memref<8x128xf32, #tpu.memory_space<vmem>>) attributes {dimension_semantics = [#tpu.dimension_semantics<parallel>], iteration_bounds = array<i64: 1>, scalar_prefetch = 0 : i64, scratch_operands = 0 : i64, tpu.core_type = #tpu.core_type<tc>, window_params = [{transform_indices = @transform_0, window_bounds = array<i64: 32, 128>}, {transform_indices = @transform_1, window_bounds = array<i64: 32, 128>}, {pipeline_mode = #tpu.pipeline_mode<synchronous>, transform_indices = @transform_2, window_bounds = array<i64: 128, 256>}, {transform_indices = @transform_3, window_bounds = array<i64: 8, 128>}]} {
    %c0 = arith.constant 0 : index
    %c0_0 = arith.constant 0 : index
    %0 = vector.load %arg1[%c0, %c0_0] : memref<32x128xbf16, #tpu.memory_space<vmem>>, vector<32x128xbf16>
    %c0_1 = arith.constant 0 : index
    %c0_2 = arith.constant 0 : index
    %1 = vector.load %arg2[%c0_1, %c0_2] : memref<32x128xbf16, #tpu.memory_space<vmem>>, vector<32x128xbf16>
    %c0_3 = arith.constant 0 : index
    %c0_4 = arith.constant 0 : index
    %2 = vector.load %arg3[%c0_3, %c0_4] : memref<128x256xbf16, #tpu.memory_space<vmem>>, vector<128x256xbf16>
    %cst = arith.constant dense<0.000000e+00> : vector<32x256xf32>
    %3 = tpu.matmul %0, %2, %cst {dimension_numbers = #tpu.dot_dimension_numbers<[1], [0], [0], [1], [0, 0, 1, 1], [], []>} : vector<32x128xbf16>, vector<128x256xbf16>, vector<32x256xf32> -> vector<32x256xf32>
    %cst_5 = arith.constant dense<0.000000e+00> : vector<32x256xf32>
    %4 = tpu.matmul %1, %2, %cst_5 {dimension_numbers = #tpu.dot_dimension_numbers<[1], [0], [0], [1], [0, 0, 1, 1], [], []>} : vector<32x128xbf16>, vector<128x256xbf16>, vector<32x256xf32> -> vector<32x256xf32>
    %5 = arith.mulf %4, %4 : vector<32x256xf32>
    %6 = vector.shape_cast %5 : vector<32x256xf32> to vector<1x32x256xf32>
    %cst_6 = arith.constant dense<0.000000e+00> : vector<1xf32>
    %7 = vector.multi_reduction <add>, %6, %cst_6 [1, 2] : vector<1x32x256xf32> to vector<1xf32>
    %8 = vector.shape_cast %7 : vector<1xf32> to vector<1x1x1xf32>
    %9 = vector.extract %8[0, 0, 0] : f32 from vector<1x1x1xf32>
    %cst_7 = arith.constant 0.000000e+00 : f32
    %10 = arith.addf %cst_7, %9 : f32
    %11 = vector.extract_strided_slice %3 {offsets = [0, 0], sizes = [32, 128], strides = [1, 1]} : vector<32x256xf32> to vector<32x128xf32>
    %12 = vector.extract_strided_slice %3 {offsets = [0, 128], sizes = [32, 128], strides = [1, 1]} : vector<32x256xf32> to vector<32x128xf32>
    %13 = vector.extract_strided_slice %4 {offsets = [0, 0], sizes = [32, 128], strides = [1, 1]} : vector<32x256xf32> to vector<32x128xf32>
    %14 = vector.extract_strided_slice %4 {offsets = [0, 128], sizes = [32, 128], strides = [1, 1]} : vector<32x256xf32> to vector<32x128xf32>
    %15 = tpu.iota {dimensions = array<i32: 1>} : vector<32x128xi32>
    %c0_i32 = arith.constant 0 : i32
    %16 = vector.broadcast %c0_i32 : i32 to vector<32x128xi32>
    %17 = arith.cmpi ne, %15, %16 : vector<32x128xi32>
    %cst_8 = arith.constant 0.000000e+00 : f32
    %18 = vector.broadcast %cst_8 : f32 to vector<32x128xf32>
    %19 = arith.select %17, %12, %18 : vector<32x128xi1>, vector<32x128xf32>
    %cst_9 = arith.constant 0.000000e+00 : f32
    %20 = vector.broadcast %cst_9 : f32 to vector<32x128xf32>
    %21 = arith.select %17, %14, %20 : vector<32x128xi1>, vector<32x128xf32>
    %22 = arith.mulf %11, %11 : vector<32x128xf32>
    %23 = arith.mulf %19, %19 : vector<32x128xf32>
    %24 = arith.addf %22, %23 : vector<32x128xf32>
    %cst_10 = arith.constant 1.000000e-07 : f32
    %25 = vector.broadcast %cst_10 : f32 to vector<32x128xf32>
    %26 = arith.maximumf %24, %25 : vector<32x128xf32>
    %27 = arith.mulf %13, %13 : vector<32x128xf32>
    %28 = arith.mulf %21, %21 : vector<32x128xf32>
    %29 = arith.addf %27, %28 : vector<32x128xf32>
    %cst_11 = arith.constant 1.000000e-07 : f32
    %30 = vector.broadcast %cst_11 : f32 to vector<32x128xf32>
    %31 = arith.maximumf %29, %30 : vector<32x128xf32>
    %32 = vector.extract_strided_slice %12 {offsets = [0, 0], sizes = [32, 1], strides = [1, 1]} : vector<32x128xf32> to vector<32x1xf32>
    %33 = vector.extract_strided_slice %14 {offsets = [0, 0], sizes = [32, 1], strides = [1, 1]} : vector<32x128xf32> to vector<32x1xf32>
    %34 = arith.mulf %32, %32 : vector<32x1xf32>
    %cst_12 = arith.constant 1.000000e-07 : f32
    %35 = vector.broadcast %cst_12 : f32 to vector<32x1xf32>
    %36 = arith.maximumf %34, %35 : vector<32x1xf32>
    %37 = arith.mulf %33, %33 : vector<32x1xf32>
    %cst_13 = arith.constant 1.000000e-07 : f32
    %38 = vector.broadcast %cst_13 : f32 to vector<32x1xf32>
    %39 = arith.maximumf %37, %38 : vector<32x1xf32>
    %40 = arith.addf %36, %39 : vector<32x1xf32>
    %41 = arith.mulf %36, %39 : vector<32x1xf32>
    %42 = math.sqrt %41 : vector<32x1xf32>
    %cst_14 = arith.constant 2.000000e+00 : f32
    %43 = vector.broadcast %cst_14 : f32 to vector<32x1xf32>
    %44 = arith.mulf %43, %42 : vector<32x1xf32>
    %45 = arith.subf %40, %44 : vector<32x1xf32>
    %46 = vector.shape_cast %45 : vector<32x1xf32> to vector<1x32x1xf32>
    %cst_15 = arith.constant dense<0.000000e+00> : vector<1xf32>
    %47 = vector.multi_reduction <add>, %46, %cst_15 [1, 2] : vector<1x32x1xf32> to vector<1xf32>
    %48 = vector.shape_cast %47 : vector<1xf32> to vector<1x1x1xf32>
    %49 = vector.extract %48[0, 0, 0] : f32 from vector<1x1x1xf32>
    %cst_16 = arith.constant 0.000000e+00 : f32
    %50 = arith.addf %cst_16, %49 : f32
    %51 = math.log %39 : vector<32x1xf32>
    %52 = math.log %36 : vector<32x1xf32>
    %53 = arith.subf %51, %52 : vector<32x1xf32>
    %54 = math.absf %53 : vector<32x1xf32>
    %55 = vector.shape_cast %54 : vector<32x1xf32> to vector<1x32x1xf32>
    %cst_17 = arith.constant dense<0.000000e+00> : vector<1xf32>
    %56 = vector.multi_reduction <add>, %55, %cst_17 [1, 2] : vector<1x32x1xf32> to vector<1xf32>
    %57 = vector.shape_cast %56 : vector<1xf32> to vector<1x1x1xf32>
    %58 = vector.extract %57[0, 0, 0] : f32 from vector<1x1x1xf32>
    %cst_18 = arith.constant 5.000000e-01 : f32
    %59 = arith.mulf %cst_18, %58 : f32
    %cst_19 = arith.constant 0.000000e+00 : f32
    %60 = arith.addf %cst_19, %59 : f32
    %61 = arith.addf %26, %31 : vector<32x128xf32>
    %62 = arith.mulf %26, %31 : vector<32x128xf32>
    %63 = math.sqrt %62 : vector<32x128xf32>
    %cst_20 = arith.constant 2.000000e+00 : f32
    %64 = vector.broadcast %cst_20 : f32 to vector<32x128xf32>
    %65 = arith.mulf %64, %63 : vector<32x128xf32>
    %66 = arith.subf %61, %65 : vector<32x128xf32>
    %67 = vector.shape_cast %66 : vector<32x128xf32> to vector<1x32x128xf32>
    %cst_21 = arith.constant dense<0.000000e+00> : vector<1xf32>
    %68 = vector.multi_reduction <add>, %67, %cst_21 [1, 2] : vector<1x32x128xf32> to vector<1xf32>
    %69 = vector.shape_cast %68 : vector<1xf32> to vector<1x1x1xf32>
    %70 = vector.extract %69[0, 0, 0] : f32 from vector<1x1x1xf32>
    %71 = arith.addf %50, %70 : f32
    %72 = math.log %31 : vector<32x128xf32>
    %73 = math.log %26 : vector<32x128xf32>
    %74 = arith.subf %72, %73 : vector<32x128xf32>
    %75 = math.absf %74 : vector<32x128xf32>
    %76 = vector.shape_cast %75 : vector<32x128xf32> to vector<1x32x128xf32>
    %cst_22 = arith.constant dense<0.000000e+00> : vector<1xf32>
    %77 = vector.multi_reduction <add>, %76, %cst_22 [1, 2] : vector<1x32x128xf32> to vector<1xf32>
    %78 = vector.shape_cast %77 : vector<1xf32> to vector<1x1x1xf32>
    %79 = vector.extract %78[0, 0, 0] : f32 from vector<1x1x1xf32>
    %cst_23 = arith.constant 5.000000e-01 : f32
    %80 = arith.mulf %cst_23, %79 : f32
    %81 = arith.addf %60, %80 : f32
    %82 = tpu.iota {dimensions = array<i32: 0>} : vector<8x128xi32>
    %c0_i32_24 = arith.constant 0 : i32
    %83 = vector.broadcast %c0_i32_24 : i32 to vector<8x128xi32>
    %84 = arith.cmpi eq, %82, %83 : vector<8x128xi32>
    %c1_i32 = arith.constant 1 : i32
    %85 = vector.broadcast %c1_i32 : i32 to vector<8x128xi32>
    %86 = arith.cmpi eq, %82, %85 : vector<8x128xi32>
    %c2_i32 = arith.constant 2 : i32
    %87 = vector.broadcast %c2_i32 : i32 to vector<8x128xi32>
    %88 = arith.cmpi eq, %82, %87 : vector<8x128xi32>
    %cst_25 = arith.constant 0.000000e+00 : f32
    %89 = vector.broadcast %81 : f32 to vector<8x128xf32>
    %90 = vector.broadcast %cst_25 : f32 to vector<8x128xf32>
    %91 = arith.select %88, %89, %90 : vector<8x128xi1>, vector<8x128xf32>
    %92 = vector.broadcast %10 : f32 to vector<8x128xf32>
    %93 = arith.select %86, %92, %91 : vector<8x128xi1>, vector<8x128xf32>
    %94 = vector.broadcast %71 : f32 to vector<8x128xf32>
    %95 = arith.select %84, %94, %93 : vector<8x128xi1>, vector<8x128xf32>
    %c0_26 = arith.constant 0 : index
    %c0_27 = arith.constant 0 : index
    %96 = vector.load %arg4[%c0_26, %c0_27] : memref<8x128xf32, #tpu.memory_space<vmem>>, vector<8x128xf32>
    tpu.vector_store %arg4[%c0_26, %c0_27], %95 {strides = array<i32>} : memref<8x128xf32, #tpu.memory_space<vmem>>, vector<8x128xf32>,
    return
  }
  func.func @transform_0(%arg0: i32) -> (i32, i32) {
    %c0_i32 = arith.constant 0 : i32
    %c0_i32_0 = arith.constant 0 : i32
    return %arg0, %c0_i32 : i32, i32
  }
  func.func @transform_1(%arg0: i32) -> (i32, i32) {
    %c0_i32 = arith.constant 0 : i32
    %c0_i32_0 = arith.constant 0 : i32
    return %arg0, %c0_i32 : i32, i32
  }
  func.func @transform_2(%arg0: i32) -> (i32, i32) {
    %c0_i32 = arith.constant 0 : i32
    %c0_i32_0 = arith.constant 0 : i32
    %c0_i32_1 = arith.constant 0 : i32
    return %c0_i32, %c0_i32_0 : i32, i32
  }
  func.func @transform_3(%arg0: i32) -> (i32, i32) {
    %c0_i32 = arith.constant 0 : i32
    %c0_i32_0 = arith.constant 0 : i32
    return %arg0, %c0_i32 : i32, i32
  }
}

</mosaic_0001>

<bundles_post_ra>
// kernel: tpu_custom_call.1
= control target key start
LH: loop header
LB: loop body
LE: loop exit
PB: predicated region body
PF: predicated region fallthrough
CT: control target
= control target key end

     0   :  { %8 = vsyncpa [#allocation3], 0  ;;  %s994_s0 = inlined_call_operand.hbm [shape: bf16[32,128], index: 0, kind: input, shape index: {}]   ;;  %s995_s1 = inlined_call_operand.hbm [shape: bf16[32,128], index: 1, kind: input, shape index: {}]   ;;  %s996_s2 = inlined_call_operand.hbm [shape: bf16[128,256], index: 2, kind: input, shape index: {}]   ;;  %s997_s3 = inlined_call_operand.hbm [shape: f32[8,128], index: 3, kind: output, shape index: {}]  }
   0x1   :  { %9 = vsyncpa [#allocation6], 0 }
   0x2   :  { %10 = vsyncpa [#allocation4], 0  ;;  %s795_s12 = smov [#allocation5]   ;;  %s796_s14 = smov [#allocation2]  }
   0x3   :  { %s28_s13 = sshll.u32 %s795_s12, 4  ;;  %s16_s15 = sshll.u32 %s796_s14, 4  ;;  %s29_s13 = int_to_ptr.vmem [resolvable:$true] %s28_s13  ;;  %s17_s15 = int_to_ptr.vmem [resolvable:$true] %s16_s15 }
   0x4   :  { %s717_s16 = scalar_lea.vmem %s29_s13, 256  ;;  %p722_p1 = scmp.lt.s32.totalorder %s29_s13, %s29_s13 }
   0x5   :  { %p718_p0 = scmp.ne.s32.totalorder %s29_s13, %s717_s16  ;;  %p723_p2 = scmp.lt.s32.totalorder %s717_s16, %s717_s16 }
   0x7   :  { %p724_p3 = por %p723_p2, %p722_p1 }
   0x9   :  { %p725_p4 = pnand %p724_p3, %p718_p0 }
   0xb   :  { %728 = shalt.err (!%p725_p4)
}
   0xc   :  { %s797_s17 = smov 64   ;;  %s798_s18 = smov 4  }
   0xd   :  { %34 = dma.hbm_to_vmem [thread:$0]  %s995_s1, 256, %s29_s13, [#allocation6], %s797_s17, %s797_s17, %s798_s18  }
   0xe   :  { %s737_s21 = scalar_lea.vmem %s17_s15, 256  ;;  %p742_p6 = scmp.lt.s32.totalorder %s17_s15, %s17_s15 }
   0xf   :  { %p738_p5 = scmp.ne.s32.totalorder %s17_s15, %s737_s21  ;;  %p743_p7 = scmp.lt.s32.totalorder %s737_s21, %s737_s21 }
  0x11   :  { %p744_p8 = por %p743_p7, %p742_p6 }
  0x13   :  { %p745_p9 = pnand %p744_p8, %p738_p5 }
  0x15   :  { %748 = shalt.err (!%p745_p9)
}
  0x16   :  { %22 = dma.hbm_to_vmem [thread:$0]  %s994_s0, 256, %s17_s15, [#allocation3], %s797_s17, %s797_s17, %s798_s18  }
  0x17   :  { %s799_s24 = smov [#allocation7]  }
  0x18   :  { %s40_s25 = sshll.u32 %s799_s24, 4  ;;  %s41_s25 = int_to_ptr.vmem [resolvable:$true] %s40_s25 }
  0x19   :  { %s757_s26 = scalar_lea.vmem %s41_s25, 2048  ;;  %p762_p11 = scmp.lt.s32.totalorder %s41_s25, %s41_s25 }
  0x1a   :  { %p758_p10 = scmp.ne.s32.totalorder %s41_s25, %s757_s26  ;;  %p763_p12 = scmp.lt.s32.totalorder %s757_s26, %s757_s26 }
  0x1c   :  { %p764_p13 = por %p763_p12, %p762_p11 }
  0x1e   :  { %p765_p0 = pnand %p764_p13, %p758_p10 }
  0x20   :  { %768 = shalt.err (!%p765_p0)
}
  0x21   :  { %s800_s1 = smov 128   ;;  %s801_s27 = smov 8  }
  0x22   :  { %46 = dma.hbm_to_vmem [thread:$0]  %s996_s2, 2048, %s41_s25, [#allocation6], %s800_s1, %s800_s1, %s801_s27  }
  0x23   :  { %789 = dma.done.wait [#allocation3], 256  }
  0x24   :  { %790 = vsyncadd [#allocation3], 4294967040 }
  0x25   :  { %791 = dma.done.wait [#allocation6], 2304  }
  0x26   :  { %792 = vsyncadd [#allocation6], 4294964992  ;;  %v802_v0 = vmov 0   ;;  %v633_v1 = vld [vmem:[#allocation7 + $0x74] ss:$8 sps:$4 sm:$0xff]   ;;  %v657_v17 = vld [vmem:[#allocation2] sm:$0xff]   ;;  %v316_v21 = vlaneseq }
  0x27   :  { %205 = vmatprep.mubr.bf16.mxu0 %v802_v0  ;;  %270 = vmatprep.mubr.bf16.mxu1 %v802_v0  ;;  %v635_v2 = vld [vmem:[#allocation7 + $0x70] ss:$8 sps:$4 sm:$0xff]   ;;  %v636_v3 = vld [vmem:[#allocation7 + $0x64] ss:$8 sps:$4 sm:$0xff]   ;;  %v638_v4 = vld [vmem:[#allocation7 + $0x60] ss:$8 sps:$4 sm:$0xff]  }
  0x28   :  { %173 = vmatprep.subr.bf16.mxu0 %v633_v1  ;;  %238 = vmatprep.subr.bf16.mxu1 %v633_v1  ;;  %v639_v5 = vld [vmem:[#allocation7 + $0x54] ss:$8 sps:$4 sm:$0xff]   ;;  %v641_v6 = vld [vmem:[#allocation7 + $0x50] ss:$8 sps:$4 sm:$0xff]   ;;  %v642_v7 = vld [vmem:[#allocation7 + $0x44] ss:$8 sps:$4 sm:$0xff]  }
  0x29   :  { %174 = vmatpush1.bf16.msra.mxu0 %v635_v2  ;;  %239 = vmatpush1.bf16.msra.mxu1 %v635_v2  ;;  %v644_v8 = vld [vmem:[#allocation7 + $0x40] ss:$8 sps:$4 sm:$0xff]   ;;  %v645_v9 = vld [vmem:[#allocation7 + $0x34] ss:$8 sps:$4 sm:$0xff]   ;;  %v647_v10 = vld [vmem:[#allocation7 + $0x30] ss:$8 sps:$4 sm:$0xff]  }
  0x2a   :  { %175 = vmatprep.subr.bf16.mxu0 %v636_v3  ;;  %240 = vmatprep.subr.bf16.mxu1 %v636_v3  ;;  %v648_v11 = vld [vmem:[#allocation7 + $0x24] ss:$8 sps:$4 sm:$0xff]   ;;  %v650_v12 = vld [vmem:[#allocation7 + $0x20] ss:$8 sps:$4 sm:$0xff]   ;;  %v651_v13 = vld [vmem:[#allocation7 + $0x14] ss:$8 sps:$4 sm:$0xff]  }
  0x2b   :  { %v653_v14 = vld [vmem:[#allocation7 + $0x10] ss:$8 sps:$4 sm:$0xff]   ;;  %v654_v15 = vld [vmem:[#allocation7 + $0x4] ss:$8 sps:$4 sm:$0xff]   ;;  %v656_v16 = vld [vmem:[#allocation7] ss:$8 sps:$4 sm:$0xff]  }
  0x2c   :  { %v658_v18 = vld [vmem:[#allocation5] sm:$0xff]   ;;  %v659_v19 = vld [vmem:[#allocation2 + $0x8] sm:$0xff]   ;;  %v660_v20 = vld [vmem:[#allocation5 + $0x8] sm:$0xff]   ;;  %v834_v22 = vand.u32 127, %v316_v21  ;;  %vm411_vm1 = vcmask 7168   ;;  %s803_s10 = smov [#allocation8]  }
  0x2d   :  { %176 = vmatpush1.bf16.msra.mxu0 %v638_v4  ;;  %241 = vmatpush1.bf16.msra.mxu1 %v638_v4  ;;  %s584_s11 = sshll.u32 %s803_s10, 4  ;;  %s585_s11 = int_to_ptr.vmem [resolvable:$true] %s584_s11 }
  0x2e   :  { %177 = vmatprep.subr.bf16.mxu0 %v639_v5  ;;  %242 = vmatprep.subr.bf16.mxu1 %v639_v5  ;;  %vm318_vm0 = vcmp.ne.s32.totalorder %v834_v22, 0  ;;  %s769_s12 = scalar_lea.vmem %s585_s11, 128  ;;  %p774_p2 = scmp.lt.s32.totalorder %s585_s11, %s585_s11 }
  0x2f   :  { %p770_p1 = scmp.ne.s32.totalorder %s585_s11, %s769_s12  ;;  %p775_p3 = scmp.lt.s32.totalorder %s769_s12, %s769_s12 }
  0x31   :  { %178 = vmatpush1.bf16.msra.mxu0 %v641_v6  ;;  %243 = vmatpush1.bf16.msra.mxu1 %v641_v6  ;;  %p776_p4 = por %p775_p3, %p774_p2 }
  0x32   :  { %179 = vmatprep.subr.bf16.mxu0 %v642_v7  ;;  %244 = vmatprep.subr.bf16.mxu1 %v642_v7 }
  0x33   :  { %p777_p5 = pnand %p776_p4, %p770_p1 }
  0x35   :  { %180 = vmatpush1.bf16.msra.mxu0 %v644_v8  ;;  %245 = vmatpush1.bf16.msra.mxu1 %v644_v8 }
  0x36   :  { %181 = vmatprep.subr.bf16.mxu0 %v645_v9  ;;  %246 = vmatprep.subr.bf16.mxu1 %v645_v9 }
  0x39   :  { %182 = vmatpush1.bf16.msra.mxu0 %v647_v10  ;;  %247 = vmatpush1.bf16.msra.mxu1 %v647_v10 }
  0x3a   :  { %183 = vmatprep.subr.bf16.mxu0 %v648_v11  ;;  %248 = vmatprep.subr.bf16.mxu1 %v648_v11 }
  0x3d   :  { %184 = vmatpush1.bf16.msra.mxu0 %v650_v12  ;;  %249 = vmatpush1.bf16.msra.mxu1 %v650_v12 }
  0x3e   :  { %185 = vmatprep.subr.bf16.mxu0 %v651_v13  ;;  %250 = vmatprep.subr.bf16.mxu1 %v651_v13 }
  0x41   :  { %186 = vmatpush1.bf16.msra.mxu0 %v653_v14  ;;  %251 = vmatpush1.bf16.msra.mxu1 %v653_v14 }
  0x42   :  { %187 = vmatprep.subr.bf16.mxu0 %v654_v15  ;;  %252 = vmatprep.subr.bf16.mxu1 %v654_v15 }
  0x45   :  { %188 = vmatpush1.bf16.msra.mxu0 %v656_v16  ;;  %253 = vmatpush1.bf16.msra.mxu1 %v656_v16 }
  0x48   :  { %206 = vmatmul.mubr.bf16.vlgmr.msra.gmra.mxu0 %v657_v17  ;;  %271 = vmatmul.mubr.bf16.vlgmr.msra.gmra.mxu1 %v658_v18 }
  0x49   :  { %215 = vmatprep.mubr.bf16.mxu0 %v802_v0  ;;  %280 = vmatprep.mubr.bf16.mxu1 %v802_v0 }
  0x50   :  { %216 = vmatmul.mubr.bf16.gmra.mxu0 %v659_v19  ;;  %281 = vmatmul.mubr.bf16.gmra.mxu1 %v660_v20 }
 0x108   :  { %v207_v23 = vpop.f32.mrf.mxu0  ;;  %v272_v24 = vpop.f32.mrf.mxu1 }
 0x109   :  { %v291_v25 = vmul.f32 %v272_v24, %v272_v24  ;;  %v327_v32 = vmul.f32 %v207_v23, %v207_v23 }
 0x10a   :  { %v209_v26 = vpop.f32.mrf.mxu0  ;;  %v274_v27 = vpop.f32.mrf.mxu1 }
 0x10b   :  { %v319_v28 = vsel %vm318_vm0, %v209_v26, 0.0  ;;  %v355_v29 = vmul.f32 %v209_v26, %v209_v26  ;;  %v292_v30 = vmul.f32 %v274_v27, %v274_v27  ;;  %v323_v31 = vsel %vm318_vm0, %v274_v27, 0.0 }
 0x10c   :  { %v331_v33 = vmul.f32 %v319_v28, %v319_v28  ;;  %v343_v34 = vmul.f32 %v323_v31, %v323_v31  ;;  %v211_v35 = vpop.f32.mrf.mxu0  ;;  %v276_v36 = vpop.f32.mrf.mxu1 }
 0x10d   :  { %v359_v37 = vmax.f32 %v355_v29, 1e-07  ;;  %v299_v38 = vadd.f32 %v292_v30, %v291_v25  ;;  %v363_v39 = vmax.f32 %v292_v30, 1e-07  ;;  %v293_v42 = vmul.f32 %v276_v36, %v276_v36 }
 0x10e   :  { %v335_v40 = vadd.f32 %v331_v33, %v327_v32  ;;  %v347_v41 = vadd.f32 %v343_v34, %v291_v25  ;;  %v213_v43 = vpop.f32.mrf.mxu0  ;;  %v278_v44 = vpop.f32.mrf.mxu1  ;;  %v328_v46 = vmul.f32 %v211_v35, %v211_v35 }
 0x10f   :  { %661 = vlog2.f32 %v359_v37  ;;  %v841_v45 = vmul.f32 %v363_v39, %v359_v37  ;;  %v320_v47 = vsel %vm318_vm0, %v213_v43, 0.0  ;;  %v300_v50 = vadd.f32 %v299_v38, %v293_v42 }
 0x110   :  { %v339_v48 = vmax.f32 %v335_v40, 1e-07  ;;  %v351_v49 = vmax.f32 %v347_v41, 1e-07  ;;  %663 = vlog2.f32 %v363_v39  ;;  %v217_v51 = vpop.f32.mrf.mxu0  ;;  %v282_v52 = vpop.f32.mrf.mxu1  ;;  %v332_v53 = vmul.f32 %v320_v47, %v320_v47 }
 0x111   :  { %665 = vrsqrt.f32 %v841_v45  ;;  %v356_v54 = vmul.f32 %v213_v43, %v213_v43  ;;  %v294_v55 = vmul.f32 %v278_v44, %v278_v44  ;;  %v324_v57 = vsel %vm318_vm0, %v278_v44, 0.0 }
 0x112   :  { %667 = vlog2.f32 %v339_v48  ;;  %v846_v56 = vmul.f32 %v351_v49, %v339_v48  ;;  %v219_v58 = vpop.f32.mrf.mxu0  ;;  %v336_v59 = vadd.f32 %v332_v53, %v328_v46  ;;  %v284_v62 = vpop.f32.mrf.mxu1  ;;  %v850_v63 = vadd.f32 %v363_v39, %v359_v37 }
 0x113   :  { %669 = vlog2.f32 %v351_v49  ;;  %v360_v60 = vmax.f32 %v356_v54, 1e-07  ;;  %v301_v61 = vadd.f32 %v300_v50, %v294_v55  ;;  %v344_v0 = vmul.f32 %v324_v57, %v324_v57 }
 0x114   :  { %671 = vrsqrt.f32 %v846_v56  ;;  %v364_v1 = vmax.f32 %v294_v55, 1e-07  ;;  %v340_v2 = vmax.f32 %v336_v59, 1e-07  ;;  %v295_v3 = vmul.f32 %v282_v52, %v282_v52  ;;  %v221_v5 = vpop.f32.mrf.mxu0  ;;  %v286_v13 = vpop.f32.mrf.mxu1 }
 0x115   :  { %673 = vlog2.f32 %v360_v60  ;;  %v321_v4 = vsel %vm318_vm0, %v219_v58, 0.0  ;;  %v855_v6 = vadd.f32 %v351_v49, %v339_v48  ;;  %v348_v7 = vadd.f32 %v344_v0, %v293_v42 }
 0x116   :  { %v857_v8 = vmul.f32 %v364_v1, %v360_v60  ;;  %675 = vlog2.f32 %v364_v1  ;;  %v329_v9 = vmul.f32 %v217_v51, %v217_v51  ;;  %v302_v10 = vadd.f32 %v301_v61, %v295_v3  ;;  %v223_v20 = vpop.f32.mrf.mxu0  ;;  %v288_v29 = vpop.f32.mrf.mxu1 }
 0x117   :  { %v333_v11 = vmul.f32 %v321_v4, %v321_v4  ;;  %v357_v12 = vmul.f32 %v219_v58, %v219_v58  ;;  %v352_v14 = vmax.f32 %v348_v7, 1e-07  ;;  %v296_v15 = vmul.f32 %v284_v62, %v284_v62 }
 0x118   :  { %677 = vrsqrt.f32 %v857_v8  ;;  %v325_v16 = vsel %vm318_vm0, %v284_v62, 0.0  ;;  %v862_v23 = vadd.f32 %v364_v1, %v360_v60  ;;  %v297_v31 = vmul.f32 %v286_v13, %v286_v13 }
 0x119   :  { %679 = vlog2.f32 %v340_v2  ;;  %v337_v17 = vadd.f32 %v333_v11, %v329_v9  ;;  %v361_v18 = vmax.f32 %v357_v12, 1e-07  ;;  %v345_v19 = vmul.f32 %v325_v16, %v325_v16 }
 0x11a   :  { %v864_v24 = vmul.f32 %v352_v14, %v340_v2  ;;  %681 = vlog2.f32 %v352_v14  ;;  %v303_v25 = vadd.f32 %v302_v10, %v296_v15  ;;  %v365_v28 = vmax.f32 %v296_v15, 1e-07 }
 0x11b   :  { %v866_v26 = vmax.f32 %v337_v17, 1e-07  ;;  %683 = vlog2.f32 %v361_v18  ;;  %v349_v27 = vadd.f32 %v345_v19, %v295_v3  ;;  %v322_v32 = vsel %vm318_vm0, %v223_v20, 0.0 }
 0x11c   :  { %v662_v30 = vpop.eup %661  ;;  %685 = vrsqrt.f32 %v864_v24  ;;  %v358_v33 = vmul.f32 %v223_v20, %v223_v20  ;;  %v874_v36 = vmul.f32 %v365_v28, %v361_v18  ;;  %v330_v37 = vmul.f32 %v221_v5, %v221_v5 }
 0x11d   :  { %v664_v34 = vpop.eup %663  ;;  %687 = vlog2.f32 %v866_v26  ;;  %v872_v35 = vmax.f32 %v349_v27, 1e-07  ;;  %v334_v39 = vmul.f32 %v322_v32, %v322_v32  ;;  %v298_v41 = vmul.f32 %v288_v29, %v288_v29 }
 0x11e   :  { %v666_v38 = vpop.eup %665  ;;  %689 = vlog2.f32 %v365_v28  ;;  %v362_v40 = vmax.f32 %v358_v33, 1e-07  ;;  %v878_v43 = vadd.f32 %v352_v14, %v340_v2  ;;  %v326_v44 = vsel %vm318_vm0, %v288_v29, 0.0 }
 0x11f   :  { %v876_v42 = vpop.eup %667  ;;  %691 = vrsqrt.f32 %v874_v36  ;;  %v304_v46 = vadd.f32 %v303_v25, %v297_v31  ;;  %v887_v48 = vmul.f32 %v872_v35, %v866_v26  ;;  %v338_v49 = vadd.f32 %v334_v39, %v330_v37 }
 0x120   :  { %v883_v47 = vpop.eup %669  ;;  %v346_v50 = vmul.f32 %v326_v44, %v326_v44  ;;  %v366_v51 = vmax.f32 %v298_v41, 1e-07  ;;  %693 = vlog2.f32 %v872_v35  ;;  %v430_v54 = vmul.f32 0.6931472, %v664_v34 }
 0x121   :  { %v889_v52 = vpop.eup %671  ;;  %v305_v53 = vadd.f32 %v304_v46, %v298_v41  ;;  %v438_v55 = vmul.f32 0.6931472, %v662_v30  ;;  %v342_v22 = vmax.f32 %v338_v49, 1e-07  ;;  %695 = vlog2.f32 %v362_v40 }
 0x122   :  { %v674_v57 = vpop.eup %673  ;;  %v350_v58 = vadd.f32 %v346_v50, %v297_v31  ;;  %v892_v59 = vmul.f32 %v366_v51, %v362_v40  ;;  %v894_v61 = vadd.f32 %v365_v28, %v361_v18  ;;  %697 = vlog2.f32 %v366_v51 }
 0x123   :  { %v676_v60 = vpop.eup %675  ;;  %306 = vadd.xlane.f32.xlu0 %v305_v53  ;;  %v440_v62 = vmul.f32 0.6931472, %v674_v57  ;;  %v445_v0 = vsub.f32 %v430_v54, %v438_v55  ;;  %699 = vrsqrt.f32 %v887_v48  ;;  %v376_v3 = vmul.f32 %v666_v38, %v841_v45 }
 0x124   :  { %v354_v1 = vmax.f32 %v350_v58, 1e-07  ;;  %v432_v2 = vmul.f32 0.6931472, %v676_v60  ;;  %701 = vrsqrt.f32 %v892_v59  ;;  %v899_v7 = vadd.f32 %v366_v51, %v362_v40 }
 0x125   :  { %v678_v4 = vpop.eup %677  ;;  %v449_v5 = vand.u32 2147483647, %v445_v0  ;;  %vm377_vm2 = vcmp.eq.f32.partialorder %v841_v45, inf  ;;  %703 = vlog2.f32 %v342_v22  ;;  %vm379_vm3 = vcmp.eq.f32.partialorder %v841_v45, 0.0 }
 0x126   :  { %v902_v9 = vpop.eup %679  ;;  %v904_v10 = vmul.f32 %v354_v1, %v342_v22  ;;  %v446_v11 = vsub.f32 %v432_v2, %v440_v62  ;;  %v378_v12 = vsel %vm377_vm2, %v841_v45, %v376_v3  ;;  %705 = vlog2.f32 %v354_v1 }
 0x127   :  { %v907_v13 = vpop.eup %681  ;;  %v380_v14 = vand.u32 2147483648, %v841_v45  ;;  %v383_v15 = vmul.f32 %v678_v4, %v857_v8  ;;  %vm384_vm4 = vcmp.eq.f32.partialorder %v857_v8, inf  ;;  %v387_v18 = vand.u32 2147483648, %v857_v8 }
 0x128   :  { %v684_v16 = vpop.eup %683  ;;  %707 = vrsqrt.f32 %v904_v10  ;;  %v450_v17 = vand.u32 2147483647, %v446_v11  ;;  %v453_v20 = vsel %vm411_vm1, %v449_v5, 0.0  ;;  %vm386_vm5 = vcmp.eq.f32.partialorder %v857_v8, 0.0 }
 0x129   :  { %v686_v19 = vpop.eup %685  ;;  %v381_v25 = vsel %vm379_vm3, %v380_v14, %v378_v12  ;;  %v385_v27 = vsel %vm384_vm4, %v857_v8, %v383_v15  ;;  %v442_v45 = vmul.f32 0.6931472, %v684_v16  ;;  %vm391_vm6 = vcmp.eq.f32.partialorder %v874_v36, inf }
 0x12a   :  { %v918_v28 = vpop.eup %687  ;;  %v454_v29 = vsel %vm411_vm1, %v450_v17, 0.0  ;;  %v388_v30 = vsel %vm386_vm5, %v387_v18, %v385_v27  ;;  %vm393_vm7 = vcmp.eq.f32.partialorder %v874_v36, 0.0  ;;  %v394_v33 = vand.u32 2147483648, %v874_v36 }
 0x12b   :  { %v690_v31 = vpop.eup %689  ;;  %v455_v32 = vadd.f32 %v454_v29, %v453_v20  ;;  %v401_v34 = vand.u32 2147483648, %v892_v59  ;;  %vm398_vm8 = vcmp.eq.f32.partialorder %v892_v59, inf  ;;  %v403_v8 = vmul.f32 2.0, %v381_v25 }
 0x12c   :  { %v692_v37 = vpop.eup %691  ;;  %v434_v38 = vmul.f32 0.6931472, %v690_v31  ;;  %v404_v39 = vmul.f32 2.0, %v388_v30  ;;  %v928_v40 = vadd.f32 %v872_v35, %v866_v26  ;;  %vm400_vm9 = vcmp.eq.f32.partialorder %v892_v59, 0.0 }
 0x12d   :  { %v390_v41 = vmul.f32 %v692_v37, %v874_v36  ;;  %v932_v44 = vadd.f32 %v354_v1, %v342_v22  ;;  %v480_v46 = vmul.f32 %v889_v52, %v846_v56  ;;  %vm481_vm10 = vcmp.eq.f32.partialorder %v846_v56, inf  ;;  %v937_v49 = vpop.eup %693 }
 0x12e   :  { %v447_v50 = vsub.f32 %v434_v38, %v442_v45  ;;  %v407_v51 = vsub.f32 %v850_v63, %v403_v8  ;;  %v408_v53 = vsub.f32 %v862_v23, %v404_v39  ;;  %vm483_vm11 = vcmp.eq.f32.partialorder %v846_v56, 0.0  ;;  %v696_v26 = vpop.eup %695 }
 0x12f   :  { %v392_v35 = vsel %vm391_vm6, %v874_v36, %v390_v41  ;;  %v482_v54 = vsel %vm481_vm10, %v846_v56, %v480_v46  ;;  %v484_v52 = vand.u32 2147483648, %v846_v56  ;;  %v487_v55 = vmul.f32 %v686_v19, %v864_v24  ;;  %v698_v57 = vpop.eup %697 }
 0x130   :  { %v444_v22 = vmul.f32 0.6931472, %v696_v26  ;;  %v451_v58 = vand.u32 2147483647, %v447_v50  ;;  %v395_v63 = vsel %vm393_vm7, %v394_v33, %v392_v35  ;;  %v412_v23 = vsel %vm411_vm1, %v407_v51, 0.0  ;;  %v700_v60 = vpop.eup %699 }
 0x131   :  { %v436_v62 = vmul.f32 0.6931472, %v698_v57  ;;  %v405_v0 = vmul.f32 2.0, %v395_v63  ;;  %v413_v1 = vsel %vm411_vm1, %v408_v53, 0.0  ;;  %v485_v2 = vsel %vm483_vm11, %v484_v52, %v482_v54  ;;  %v702_v3 = vpop.eup %701 }
 0x132   :  { %v456_v4 = vsel %vm411_vm1, %v451_v58, 0.0  ;;  %v414_v56 = vadd.f32 %v413_v1, %v412_v23  ;;  %vm488_vm12 = vcmp.eq.f32.partialorder %v864_v24, inf  ;;  %vm490_vm13 = vcmp.eq.f32.partialorder %v864_v24, 0.0  ;;  %v704_v5 = vpop.eup %703 }
 0x133   :  { %v448_v11 = vsub.f32 %v436_v62, %v444_v22  ;;  %v457_v36 = vadd.f32 %v456_v4, %v455_v32  ;;  %v397_v12 = vmul.f32 %v702_v3, %v892_v59  ;;  %v409_v14 = vsub.f32 %v894_v61, %v405_v0  ;;  %v706_v15 = vpop.eup %705 }
 0x134   :  { %v489_v16 = vsel %vm488_vm12, %v864_v24, %v487_v55  ;;  %v491_v17 = vand.u32 2147483648, %v864_v24  ;;  %v494_v18 = vmul.f32 %v700_v60, %v887_v48  ;;  %vm495_vm14 = vcmp.eq.f32.partialorder %v887_v48, inf }
 0x135   :  { %v708_v19 = vpop.eup %707  ;;  %v452_v20 = vand.u32 2147483647, %v448_v11  ;;  %v399_v25 = vsel %vm398_vm8, %v892_v59, %v397_v12  ;;  %v415_v27 = vsel %vm411_vm1, %v409_v14, 0.0  ;;  %vm497_vm15 = vcmp.eq.f32.partialorder %v887_v48, 0.0 }
 0x136   :  { %v402_v61 = vsel %vm400_vm9, %v401_v34, %v399_v25  ;;  %v416_v45 = vadd.f32 %v415_v27, %v414_v56  ;;  %v492_v29 = vsel %vm490_vm13, %v491_v17, %v489_v16  ;;  %v496_v30 = vsel %vm495_vm14, %v887_v48, %v494_v18 }
 0x137   :  { %v458_v31 = vsel %vm411_vm1, %v452_v20, 0.0  ;;  %v406_v32 = vmul.f32 2.0, %v402_v61  ;;  %v498_v33 = vand.u32 2147483648, %v887_v48  ;;  %v501_v37 = vmul.f32 %v708_v19, %v904_v10 }
 0x138   :  { %v459_v38 = vadd.f32 %v458_v31, %v457_v36  ;;  %vm502_vm0 = vcmp.eq.f32.partialorder %v904_v10, inf  ;;  %vm504_vm2 = vcmp.eq.f32.partialorder %v904_v10, 0.0  ;;  %v505_v59 = vand.u32 2147483648, %v904_v10 }
 0x139   :  { %v410_v34 = vsub.f32 %v899_v7, %v406_v32  ;;  %v499_v24 = vsel %vm497_vm15, %v498_v33, %v496_v30  ;;  %v503_v8 = vsel %vm502_vm0, %v904_v10, %v501_v37  ;;  %v507_v39 = vmul.f32 2.0, %v485_v2 }
 0x13a   :  { %460 = vadd.xlane.f32.xlu1 %v459_v38  ;;  %v506_v41 = vsel %vm504_vm2, %v505_v59, %v503_v8  ;;  %v508_v46 = vmul.f32 2.0, %v492_v29  ;;  %v509_v50 = vmul.f32 2.0, %v499_v24  ;;  %v529_v48 = vmul.f32 0.6931472, %v883_v47 }
 0x13b   :  { %v417_v51 = vsel %vm411_vm1, %v410_v34, 0.0  ;;  %v510_v53 = vmul.f32 2.0, %v506_v41  ;;  %v511_v26 = vsub.f32 %v855_v6, %v507_v39  ;;  %v531_v35 = vmul.f32 0.6931472, %v907_v13 }
 0x13c   :  { %v418_v54 = vadd.f32 %v417_v51, %v416_v45  ;;  %v512_v7 = vsub.f32 %v878_v43, %v508_v46  ;;  %v513_v52 = vsub.f32 %v928_v40, %v509_v50  ;;  %v533_v10 = vmul.f32 0.6931472, %v937_v49 }
 0x13d   :  { %v535_v55 = vmul.f32 0.6931472, %v706_v15  ;;  %v537_v57 = vmul.f32 0.6931472, %v876_v42  ;;  %v539_v22 = vmul.f32 0.6931472, %v902_v9  ;;  %v514_v47 = vsub.f32 %v932_v44, %v510_v53 }
 0x13e   :  { %419 = vadd.xlane.f32.xlu0 %v418_v54  ;;  %v515_v58 = vadd.f32 %v512_v7, %v511_v26  ;;  %v541_v6 = vmul.f32 0.6931472, %v918_v28  ;;  %v543_v63 = vmul.f32 0.6931472, %v704_v5  ;;  %v567_v51 = vshrl.u32 %v316_v21, 7 }
 0x13f   :  { %v544_v13 = vsub.f32 %v529_v48, %v537_v57  ;;  %v545_v23 = vsub.f32 %v531_v35, %v539_v22 }
 0x140   :  { %v516_v60 = vadd.f32 %v515_v58, %v513_v52  ;;  %v546_v43 = vsub.f32 %v533_v10, %v541_v6  ;;  %v547_v62 = vsub.f32 %v535_v55, %v543_v63  ;;  %vm570_vm1 = vcmp.eq.s32.totalorder %v567_v51, 2 }
 0x141   :  { %v548_v40 = vand.u32 2147483647, %v544_v13  ;;  %v549_v0 = vand.u32 2147483647, %v545_v23  ;;  %vm569_vm3 = vcmp.eq.s32.totalorder %v567_v51, 1  ;;  %vm568_vm4 = vcmp.eq.s32.totalorder %v567_v51, 0 }
 0x142   :  { %v517_v49 = vadd.f32 %v516_v60, %v514_v47  ;;  %v550_v1 = vand.u32 2147483647, %v546_v43  ;;  %v551_v2 = vand.u32 2147483647, %v547_v62 }
 0x143   :  { %v552_v42 = vadd.f32 %v549_v0, %v548_v40 }
 0x144   :  { %518 = vadd.xlane.f32.xlu1 %v517_v49 }
 0x145   :  { %v553_v9 = vadd.f32 %v552_v42, %v550_v1 }
 0x147   :  { %v554_v3 = vadd.f32 %v553_v9, %v551_v2 }
 0x149   :  { %555 = vadd.xlane.f32.xlu0 %v554_v3 }
 0x1ac   :  { %v307_v44 = vpop.xlane.xlu0 %306 }
 0x1ad   :  { %v308_v4 = vrot.slane %v307_v44, 4 }
 0x1af   :  { %v309_v56 = vadd.f32 %v308_v4, %v307_v44 }
 0x1b1   :  { %v310_v28 = vrot.slane %v309_v56, 2 }
 0x1b3   :  { %v311_v5 = vadd.f32 %v310_v28, %v309_v56 }
 0x1b5   :  { %v312_v11 = vrot.slane %v311_v5, 1 }
 0x1b7   :  { %v313_v36 = vadd.f32 %v312_v11, %v311_v5 }
 0x1b9   :  { %614 = vpush %v313_v36 }
 0x1c3   :  { %v461_v12 = vpop.xlane.xlu1 %460 }
 0x1c4   :  { %v462_v14 = vrot.slane %v461_v12, 4 }
 0x1c6   :  { %v463_v15 = vadd.f32 %v462_v14, %v461_v12 }
 0x1c7   :  { %v420_v16 = vpop.xlane.xlu0 %419 }
 0x1c8   :  { %v464_v17 = vrot.slane %v463_v15, 2  ;;  %v421_v18 = vrot.slane %v420_v16, 4 }
 0x1ca   :  { %v422_v19 = vadd.f32 %v421_v18, %v420_v16  ;;  %v465_v20 = vadd.f32 %v464_v17, %v463_v15 }
 0x1cc   :  { %v423_v25 = vrot.slane %v422_v19, 2  ;;  %v466_v29 = vrot.slane %v465_v20, 1 }
 0x1cd   :  { %v519_v27 = vpop.xlane.xlu1 %518 }
 0x1ce   :  { %v520_v61 = vrot.slane %v519_v27, 4  ;;  %v424_v45 = vadd.f32 %v423_v25, %v422_v19  ;;  %v467_v59 = vadd.f32 %v466_v29, %v465_v20 }
 0x1d0   :  { %v521_v30 = vadd.f32 %v520_v61, %v519_v27  ;;  %v425_v31 = vrot.slane %v424_v45, 1 }
 0x1d2   :  { %v522_v32 = vrot.slane %v521_v30, 2  ;;  %v556_v33 = vpop.xlane.xlu0 %555  ;;  %v426_v37 = vadd.f32 %v425_v31, %v424_v45 }
 0x1d3   :  { %v557_v38 = vrot.slane %v556_v33, 4 }
 0x1d4   :  { %v523_v34 = vadd.f32 %v522_v32, %v521_v30  ;;  %616 = vpush %v426_v37 }
 0x1d5   :  { %v558_v24 = vadd.f32 %v557_v38, %v556_v33  ;;  %618 = vpush %v467_v59 }
 0x1d6   :  { %v524_v8 = vrot.slane %v523_v34, 1 }
 0x1d7   :  { %v559_v39 = vrot.slane %v558_v24, 2 }
 0x1d8   :  { %v525_v41 = vadd.f32 %v524_v8, %v523_v34 }
 0x1d9   :  { %v560_v46 = vadd.f32 %v559_v39, %v558_v24 }
 0x1da   :  { %620 = vpush %v525_v41 }
 0x1db   :  { %v561_v50 = vrot.slane %v560_v46, 1 }
 0x1dd   :  { %v562_v48 = vadd.f32 %v561_v50, %v560_v46 }
 0x1df   :  { %622 = vpush %v562_v48 }
 0x1ea   :  { %s615_s0 = spop %614 }
 0x1eb   :  { %v573_v26 = vstv %s615_s0 }
 0x205   :  { %s617_s2 = spop %616 }
 0x206   :  { %s619_s30 = spop %618 }
 0x207   :  { %s469_s5 = smul.f32 0.5, %s619_s30 }
 0x20b   :  { %s621_s4 = spop %620 }
 0x20c   :  { %s527_s8 = sadd.f32 %s621_s4, %s617_s2 }
 0x20e   :  { %v575_v54 = vstv %s527_s8 }
 0x210   :  { %s623_s6 = spop %622 }
 0x211   :  { %s564_s7 = smul.f32 0.5, %s623_s6 }
 0x213   :  { %s565_s9 = sadd.f32 %s564_s7, %s469_s5 }
 0x215   :  { %v571_v53 = vstv %s565_s9 }
 0x216   :  { %v572_v35 = vsel %vm570_vm1, %v571_v53, 0.0 }
 0x217   :  { %v574_v7 = vsel %vm569_vm3, %v573_v26, %v572_v35 }
 0x218   :  { %v576_v52 = vsel %vm568_vm4, %v575_v54, %v574_v7 }
 0x219   :  { %577 = vst [vmem:[#allocation8] sm:$0xff] %v576_v52 }
 0x21a   :  { %780 = shalt.err (!%p777_p5)
}
 0x21b   :  { %587 = dma.vmem_to_hbm [thread:$0]  %s585_s11, 128, %s997_s3, [#allocation4]  }
 0x21c   :  { %793 = dma.done.wait [#allocation4], 128  }
 0x21d   :  { %794 = vsyncadd [#allocation4], 4294967168 }
 0x21e   :  { %591 = vsyncpa [#allocation3], 1 }
 0x21f   :  { %592 = vsyncpa [#allocation6], 1 }
 0x220   :  { %593 = vsyncpa [#allocation4], 1 }

</bundles_post_ra>
